<compile_context>
chip_gen: v5e
topology: v5e:2x2
jax: 0.10.0
libtpu: 0.0.40
codegen_flags: <defaults>
</compile_context>

<pallas_src>
import jax
import jax.numpy as jnp
from jax.experimental import pallas as pl
from jax.experimental.pallas import tpu as pltpu

NEG_SLOPE = 0.2          # GATConv negative_slope
NEG_INF = -1e30
LANES = 128              # lane width of all packed operands
SUBS = 8                 # sublane height of the per-query rowpack tile


# ----------------------------------------------------------------------------
# Pallas kernel: per-query hot path (grid step i handles query node v_ids[i]).
# ----------------------------------------------------------------------------
def _kernel(vids_ref, rows_ref, c_ref, base_ref, gat_ref, out_ref):
    f32 = jnp.float32
    v = vids_ref[pl.program_id(0)]                 # int32 scalar from SMEM

    rp = rows_ref[0]                               # (8, 128) gathered row tile
    aerow = rp[0:1, :]                             # A_e[v, :]   (zero padded)
    aprow = rp[1:2, :]                             # A_P[v, :]
    wcol = rp[2:3, :]                              # W_rev[:, v]
    mrow = rp[3:4, :]                              # GAT mask row v (self-loops)

    cvec = c_ref[...]                              # (1, 128)  g.c^T
    base = base_ref[...]                           # (1, 128)  (W_rev @ 1)^T

    # c1[v] = (A_e @ c)[v],  c2[v] = (A_P @ c)[v]  -- two VPU dots + lane reduce
    c1v = jnp.sum(aerow * cvec, axis=1, keepdims=True)          # (1, 1)
    c2v = jnp.sum(aprow * cvec, axis=1, keepdims=True)          # (1, 1)

    # emb2 = W_rev @ notj0  with notj0 = 1 except notj0[v] = 0
    #      = (W_rev @ 1) - W_rev[:, v]
    emb2 = base - wcol                                          # (1, 128)
    lane = jax.lax.broadcasted_iota(jnp.int32, (1, LANES), 1)
    emb2v = jnp.sum(jnp.where(lane == v, emb2, f32(0.0)),
                    axis=1, keepdims=True)                      # (1, 1)

    # GATConv + theta_v3, rank-1 reduced (node features are scalar * w vector).
    al = gat_ref[:, 0:1]                           # (H,1) att_l scale
    ar = gat_ref[:, 1:2]                           # (H,1) att_r scale
    s = gat_ref[:, 2:3]                            # (H,1) (Wl@Wv)_h . Wv3_h
    b0 = gat_ref[0:1, 3:4]                         # (1,1) bias @ Wv3^T

    logits = al * emb2 + ar * emb2v                              # (H, 128)
    logits = jnp.where(logits >= 0, logits, NEG_SLOPE * logits)  # leaky_relu
    logits = jnp.where(mrow > 0.5, logits, NEG_INF)              # single mask
    mx = jnp.max(logits, axis=1, keepdims=True)                  # (H, 1)
    pu = jnp.exp(logits - mx)                      # masked / padded lanes -> 0
    denom = jnp.sum(pu, axis=1, keepdims=True)                   # (H, 1)
    num = jnp.sum(pu * emb2, axis=1, keepdims=True)              # (H, 1)
    inv = pl.reciprocal(denom, approx=False)                     # EUP
    v3v = jnp.sum(s * num * inv, axis=0, keepdims=True) + b0     # (1, 1)

    # One unmasked lane-dense store of the 3 scalars for this query.
    lane_o = jax.lax.broadcasted_iota(jnp.int32, (1, SUBS, LANES), 2)
    out_ref[...] = (jnp.where(lane_o == 0, c1v, f32(0.0))
                    + jnp.where(lane_o == 1, c2v, f32(0.0))
                    + jnp.where(lane_o == 2, v3v, f32(0.0)))


def pallas_net_mlp_scalars(v_ids, pre):
    """Run the kernel for a batch of query nodes. Returns (c1[v], c2[v], v3[v])."""
    V = v_ids.shape[0]
    H = pre["gatp"].shape[0]

    grid_spec = pltpu.PrefetchScalarGridSpec(
        num_scalar_prefetch=1,                    # v_ids -> SMEM, used by index maps
        grid=(V,),
        in_specs=[
            # gather only the (8,128) row tile of query v_ids[i]
            pl.BlockSpec((1, SUBS, LANES), lambda i, vids: (vids[i], 0, 0)),
            # graph constants: DMA'd once, resident across the whole grid
            pl.BlockSpec((1, LANES), lambda i, vids: (0, 0)),
            pl.BlockSpec((1, LANES), lambda i, vids: (0, 0)),
            pl.BlockSpec((H, LANES), lambda i, vids: (0, 0)),
        ],
        out_specs=pl.BlockSpec((1, SUBS, LANES), lambda i, vids: (i, 0, 0)),
    )

    out = pl.pallas_call(
        _kernel,
        out_shape=jax.ShapeDtypeStruct((V, SUBS, LANES), jnp.float32),
        grid_spec=grid_spec,
        compiler_params=pltpu.CompilerParams(
            dimension_semantics=("parallel",)),    # shard queries across TCs (v7x)
    )(v_ids, pre["rowpack"], pre["cvec"], pre["base"], pre["gatp"])

    return out[:, 0, 0], out[:, 0, 1], out[:, 0, 2]


# ----------------------------------------------------------------------------
# Hoisted precompute: all query-independent packing, run ONCE per graph/weights.
# ----------------------------------------------------------------------------
def precompute_graph(dense, params, N, F, H):
    assert N <= LANES and 4 <= SUBS
    C = F
    with jax.default_matmul_precision("highest"):
        w = (params["Wl"] @ params["Wv"])[:, 0]                 # (H*C,) = Wl @ Wv
    al = (w * params["att_l"][0]).reshape(H, C).sum(axis=1)     # (H,)
    ar = (w * params["att_r"][0]).reshape(H, C).sum(axis=1)     # (H,)
    s = (w * params["Wv3"][0]).reshape(H, C).sum(axis=1)        # (H,)
    b0 = jnp.sum(params["bias"][0] * params["Wv3"][0])          # scalar

    gatp = jnp.zeros((H, LANES), jnp.float32)
    gatp = gatp.at[:, 0].set(al).at[:, 1].set(ar).at[:, 2].set(s).at[0, 3].set(b0)

    def pad_row(x):                                             # (N,) -> (1,128)
        return jnp.zeros((1, LANES), jnp.float32).at[0, :N].set(x)

    cvec = pad_row(dense["c"][:, 0])                            # g.c
    base = pad_row(jnp.sum(dense["W_rev"], axis=1))             # W_rev @ 1

    # Per-node row tile: [A_e[v,:], A_P[v,:], W_rev[:,v], mask[v,:]] zero-padded.
    rowpack = jnp.zeros((N, SUBS, LANES), jnp.float32)
    rowpack = rowpack.at[:, 0, :N].set(dense["A_e"])
    rowpack = rowpack.at[:, 1, :N].set(dense["A_P"])
    rowpack = rowpack.at[:, 2, :N].set(dense["W_rev"].T)
    rowpack = rowpack.at[:, 3, :N].set(dense["mask"])

    return dict(rowpack=rowpack, cvec=cvec, base=base, gatp=gatp)


# ----------------------------------------------------------------------------
# Per-call wrapper: branch logic of Net_MLP.forward (batch of query nodes v).
# ----------------------------------------------------------------------------
def net_mlp_forward(pre, v_ids, e1, has_prec_edges, train=True, only_clast=False):
    c1v, c2v, v3v = pallas_net_mlp_scalars(v_ids, pre)
    if has_prec_edges:
        c_last = jnp.maximum(c1v, c2v) + e1
    else:
        c_last = c1v + e1
    if only_clast:
        return c_last
    if train:
        return v3v
    return v3v + c_last
# TODO(synk): batch_size > 1 branch references undefined attrs (g.mu, embedfinal,
# theta7) in the original module, so it is not implemented.


# ----------------------------------------------------------------------------
# Pure-JAX dense reference (original, un-reduced GAT math) for validation
# ----------------------------------------------------------------------------
def ref_forward(dense, params, v, e1, has_prec_edges, N, F, H,
                train=True, only_clast=False):
    C = F
    with jax.default_matmul_precision("highest"):
        c = dense["c"]
        notj0 = jnp.ones((N, 1), jnp.float32).at[v].set(0.0)
        c1 = dense["A_e"] @ c
        c2 = dense["A_P"] @ c
        emb2 = dense["W_rev"] @ notj0
        mu2 = emb2 @ params["Wv"].T                       # theta_v
        xl = (mu2 @ params["Wl"].T).reshape(N, H, C)      # gat.lin_l
        alpha_l = (xl * params["att_l"].reshape(1, H, C)).sum(-1)   # (N,H)
        alpha_r = (xl * params["att_r"].reshape(1, H, C)).sum(-1)
        mask = dense["mask"]
        outs = []
        for h in range(H):
            logits = alpha_r[:, h:h + 1] + alpha_l[:, h:h + 1].T
            logits = jnp.where(logits >= 0, logits, NEG_SLOPE * logits)
            logits = jnp.where(mask > 0.5, logits, NEG_INF)
            mx = jnp.max(logits, axis=1, keepdims=True)
            p = jnp.exp(logits - mx) * mask
            p = p / jnp.sum(p, axis=1, keepdims=True)
            outs.append(p @ xl[:, h, :])
        out = jnp.concatenate(outs, axis=1) + params["bias"]
        v3 = out @ params["Wv3"].T                        # theta_v3
    c1v, c2v, v3v = c1[v, 0], c2[v, 0], v3[v, 0]
    c_last = (jnp.maximum(c1v, c2v) if has_prec_edges else c1v) + e1
    if only_clast:
        return c_last
    if train:
        return v3v
    return v3v + c_last


# ----------------------------------------------------------------------------
# Deterministic synthetic graph + parameters
# ----------------------------------------------------------------------------
def build_dense(key, N):
    kc, kpt = jax.random.split(key)
    c = jax.random.uniform(kc, (N, 1), jnp.float32, 0.5, 5.0)          # g.c

    # e[0]: ring edges j -> (j+1) % N
    src_e = jnp.arange(N)
    tgt_e = (jnp.arange(N) + 1) % N
    A_e = jnp.zeros((N, N), jnp.float32).at[tgt_e, src_e].add(1.0)

    # precedence edges j -> j+2
    src_p = jnp.arange(N - 2)
    tgt_p = jnp.arange(N - 2) + 2
    A_P = jnp.zeros((N, N), jnp.float32).at[tgt_p, src_p].add(1.0)

    # index_m[m-1]: directed clique over the machine's operations
    mach = [1, 3, 5, 7, 9, 11]
    src_m, tgt_m = [], []
    for a in mach:
        for b in mach:
            if a != b:
                src_m.append(a)
                tgt_m.append(b)
    src_m = jnp.array(src_m)
    tgt_m = jnp.array(tgt_m)
    PT = jax.random.uniform(kpt, (src_m.shape[0],), jnp.float32, 1.0, 4.0)

    # EmbeddingMachine2 aggregates over REVERSED machine edges with PT weights:
    # out[src_m[k]] += PT[k] * notj[tgt_m[k]]
    W_rev = jnp.zeros((N, N), jnp.float32).at[src_m, tgt_m].add(PT)

    # GAT adjacency mask on m_edge: remove_self_loops + add_self_loops
    mask = jnp.zeros((N, N), jnp.float32).at[tgt_m, src_m].set(1.0)
    mask = jnp.maximum(mask, jnp.eye(N, dtype=jnp.float32))

    return dict(c=c, A_e=A_e, A_P=A_P, W_rev=W_rev, mask=mask)


def init_params(key, F, H):
    C = F
    HC = H * C
    ks = jax.random.split(key, 6)

    def glorot(k, shape):
        lim = jnp.sqrt(6.0 / (shape[0] + shape[-1]))
        return jax.random.uniform(k, shape, jnp.float32, -lim, lim)

    Wv = glorot(ks[0], (F, 1))        # theta_v  : Linear(1, F, bias=False)
    Wl = glorot(ks[1], (HC, F))       # gat.lin_l: Linear(F, H*C, bias=False)
    att_l = glorot(ks[2], (1, HC))    # gat.att_l flattened from (1, H, C)
    att_r = glorot(ks[3], (1, HC))    # gat.att_r flattened from (1, H, C)
    bias = 0.1 * jax.random.normal(ks[4], (1, HC), jnp.float32)  # gat.bias
    Wv3 = glorot(ks[5], (1, HC))      # theta_v3 : Linear(H*F, 1, bias=False)
    return dict(Wv=Wv, Wl=Wl, att_l=att_l, att_r=att_r, bias=bias, Wv3=Wv3)


if __name__ == "__main__":
    N, F, H = 16, 32, 4      # nodes, num_feats, heads
    e1 = jnp.float32(0.5)    # e[1] scalar
    key = jax.random.PRNGKey(0)
    kd, kp = jax.random.split(key)
    dense = build_dense(kd, N)
    params = init_params(kp, F, H)

    # Query-independent packing: runs ONCE per (graph, weights), off the hot path.
    pre = precompute_graph(dense, params, N, F, H)
    pre = {k: jax.block_until_ready(v) for k, v in pre.items()}

    # Batch of query operation nodes processed by one pallas_call.
    v_ids = jnp.array([3, 0, 5, 7, 9, 11, 2, 15], dtype=jnp.int32)

    cases = [(True, False, True), (False, False, True),
             (False, True, True), (True, False, False)]
    for train, only_clast, has_prec in cases:
        q = net_mlp_forward(pre, v_ids, e1, has_prec,
                            train=train, only_clast=only_clast)
        q = jax.block_until_ready(q)
        q_ref = jnp.stack([ref_forward(dense, params, int(v), e1, has_prec,
                                       N, F, H, train=train,
                                       only_clast=only_clast)
                           for v in list(v_ids)])
        assert jnp.allclose(q, q_ref, rtol=1e-3, atol=1e-3), \
            (train, only_clast, has_prec, q, q_ref)

    print("KERNEL_OK")
</pallas_src>

<mosaic_0001>
module attributes {stable_mosaic.version = 11 : i64} {
  func.func @_kernel(%arg0: i32, %arg1: memref<8xi32, #tpu.memory_space<smem>>, %arg2: memref<1x8x128xf32, #tpu.memory_space<vmem>>, %arg3: memref<1x128xf32, #tpu.memory_space<vmem>>, %arg4: memref<1x128xf32, #tpu.memory_space<vmem>>, %arg5: memref<4x128xf32, #tpu.memory_space<vmem>>, %arg6: memref<1x8x128xf32, #tpu.memory_space<vmem>>) attributes {dimension_semantics = [#tpu.dimension_semantics<parallel>], iteration_bounds = array<i64: 8>, scalar_prefetch = 1 : i64, scratch_operands = 0 : i64, tpu.core_type = #tpu.core_type<tc>, window_params = [{transform_indices = @transform_0, window_bounds = array<i64: 1, 8, 128>}, {pipeline_mode = #tpu.pipeline_mode<synchronous>, transform_indices = @transform_1, window_bounds = array<i64: 1, 128>}, {pipeline_mode = #tpu.pipeline_mode<synchronous>, transform_indices = @transform_2, window_bounds = array<i64: 1, 128>}, {pipeline_mode = #tpu.pipeline_mode<synchronous>, transform_indices = @transform_3, window_bounds = array<i64: 4, 128>}, {transform_indices = @transform_4, window_bounds = array<i64: 1, 8, 128>}]} {
    %0 = arith.index_cast %arg0 : i32 to index
    %1 = memref.load %arg1[%0] : memref<8xi32, #tpu.memory_space<smem>>
    %c0 = arith.constant 0 : index
    %c0_0 = arith.constant 0 : index
    %c0_1 = arith.constant 0 : index
    %2 = vector.load %arg2[%c0, %c0_0, %c0_1] : memref<1x8x128xf32, #tpu.memory_space<vmem>>, vector<1x8x128xf32>
    %3 = vector.shape_cast %2 : vector<1x8x128xf32> to vector<8x128xf32>
    %4 = vector.extract_strided_slice %3 {offsets = [0, 0], sizes = [1, 128], strides = [1, 1]} : vector<8x128xf32> to vector<1x128xf32>
    %5 = vector.extract_strided_slice %3 {offsets = [1, 0], sizes = [1, 128], strides = [1, 1]} : vector<8x128xf32> to vector<1x128xf32>
    %6 = vector.extract_strided_slice %3 {offsets = [2, 0], sizes = [1, 128], strides = [1, 1]} : vector<8x128xf32> to vector<1x128xf32>
    %7 = vector.extract_strided_slice %3 {offsets = [3, 0], sizes = [1, 128], strides = [1, 1]} : vector<8x128xf32> to vector<1x128xf32>
    %c0_2 = arith.constant 0 : index
    %c0_3 = arith.constant 0 : index
    %8 = vector.load %arg3[%c0_2, %c0_3] : memref<1x128xf32, #tpu.memory_space<vmem>>, vector<1x128xf32>
    %c0_4 = arith.constant 0 : index
    %c0_5 = arith.constant 0 : index
    %9 = vector.load %arg4[%c0_4, %c0_5] : memref<1x128xf32, #tpu.memory_space<vmem>>, vector<1x128xf32>
    %10 = arith.mulf %4, %8 : vector<1x128xf32>
    %cst = arith.constant dense<0.000000e+00> : vector<1xf32>
    %11 = vector.multi_reduction <add>, %10, %cst [1] : vector<1x128xf32> to vector<1xf32>
    %12 = vector.shape_cast %11 : vector<1xf32> to vector<1x1xf32>
    %13 = arith.mulf %5, %8 : vector<1x128xf32>
    %cst_6 = arith.constant dense<0.000000e+00> : vector<1xf32>
    %14 = vector.multi_reduction <add>, %13, %cst_6 [1] : vector<1x128xf32> to vector<1xf32>
    %15 = vector.shape_cast %14 : vector<1xf32> to vector<1x1xf32>
    %16 = arith.subf %9, %6 : vector<1x128xf32>
    %17 = tpu.iota {dimensions = array<i32: 1>} : vector<1x128xi32>
    %18 = vector.broadcast %1 : i32 to vector<1x128xi32>
    %19 = arith.cmpi eq, %17, %18 : vector<1x128xi32>
    %cst_7 = arith.constant 0.000000e+00 : f32
    %20 = vector.broadcast %cst_7 : f32 to vector<1x128xf32>
    %21 = arith.select %19, %16, %20 : vector<1x128xi1>, vector<1x128xf32>
    %cst_8 = arith.constant dense<0.000000e+00> : vector<1xf32>
    %22 = vector.multi_reduction <add>, %21, %cst_8 [1] : vector<1x128xf32> to vector<1xf32>
    %23 = vector.shape_cast %22 : vector<1xf32> to vector<1x1xf32>
    %c0_9 = arith.constant 0 : index
    %c0_10 = arith.constant 0 : index
    %24 = vector.load %arg5[%c0_9, %c0_10] : memref<4x128xf32, #tpu.memory_space<vmem>>, vector<4x1xf32>
    %c0_11 = arith.constant 0 : index
    %c1 = arith.constant 1 : index
    %25 = vector.load %arg5[%c0_11, %c1] : memref<4x128xf32, #tpu.memory_space<vmem>>, vector<4x1xf32>
    %c0_12 = arith.constant 0 : index
    %c2 = arith.constant 2 : index
    %26 = vector.load %arg5[%c0_12, %c2] : memref<4x128xf32, #tpu.memory_space<vmem>>, vector<4x1xf32>
    %c0_13 = arith.constant 0 : index
    %c3 = arith.constant 3 : index
    %27 = vector.load %arg5[%c0_13, %c3] : memref<4x128xf32, #tpu.memory_space<vmem>>, vector<1x1xf32>
    %28 = vector.broadcast %24 : vector<4x1xf32> to vector<4x128xf32>
    %29 = vector.broadcast %16 : vector<1x128xf32> to vector<4x128xf32>
    %30 = arith.mulf %28, %29 : vector<4x128xf32>
    %31 = vector.broadcast %23 : vector<1x1xf32> to vector<4x1xf32>
    %32 = arith.mulf %25, %31 : vector<4x1xf32>
    %33 = vector.broadcast %32 : vector<4x1xf32> to vector<4x128xf32>
    %34 = arith.addf %30, %33 : vector<4x128xf32>
    %cst_14 = arith.constant 0.000000e+00 : f32
    %35 = vector.broadcast %cst_14 : f32 to vector<4x128xf32>
    %36 = arith.cmpf oge, %34, %35 : vector<4x128xf32>
    %cst_15 = arith.constant 2.000000e-01 : f32
    %37 = vector.broadcast %cst_15 : f32 to vector<4x128xf32>
    %38 = arith.mulf %37, %34 : vector<4x128xf32>
    %39 = arith.select %36, %34, %38 : vector<4x128xi1>, vector<4x128xf32>
    %cst_16 = arith.constant 5.000000e-01 : f32
    %40 = vector.broadcast %cst_16 : f32 to vector<1x128xf32>
    %41 = arith.cmpf ogt, %7, %40 : vector<1x128xf32>
    %cst_17 = arith.constant -1.000000e+30 : f32
    %42 = vector.shape_cast %41 : vector<1x128xi1> to vector<1x128xi1>
    %43 = vector.broadcast %42 : vector<1x128xi1> to vector<4x128xi1>
    %44 = vector.broadcast %cst_17 : f32 to vector<4x128xf32>
    %45 = arith.select %43, %39, %44 : vector<4x128xi1>, vector<4x128xf32>
    %cst_18 = arith.constant dense<0xFF800000> : vector<4xf32>
    %46 = vector.multi_reduction <maximumf>, %45, %cst_18 [1] : vector<4x128xf32> to vector<4xf32>
    %47 = vector.shape_cast %46 : vector<4xf32> to vector<4x1xf32>
    %48 = vector.broadcast %47 : vector<4x1xf32> to vector<4x128xf32>
    %49 = arith.subf %45, %48 : vector<4x128xf32>
    %50 = math.exp %49 : vector<4x128xf32>
    %cst_19 = arith.constant dense<0.000000e+00> : vector<4xf32>
    %51 = vector.multi_reduction <add>, %50, %cst_19 [1] : vector<4x128xf32> to vector<4xf32>
    %52 = vector.shape_cast %51 : vector<4xf32> to vector<4x1xf32>
    %53 = vector.broadcast %16 : vector<1x128xf32> to vector<4x128xf32>
    %54 = arith.mulf %50, %53 : vector<4x128xf32>
    %cst_20 = arith.constant dense<0.000000e+00> : vector<4xf32>
    %55 = vector.multi_reduction <add>, %54, %cst_20 [1] : vector<4x128xf32> to vector<4xf32>
    %56 = vector.shape_cast %55 : vector<4xf32> to vector<4x1xf32>
    %57 = tpu.reciprocal %52 : vector<4x1xf32> -> vector<4x1xf32>
    %58 = arith.mulf %26, %56 : vector<4x1xf32>
    %59 = arith.mulf %58, %57 : vector<4x1xf32>
    %cst_21 = arith.constant dense<0.000000e+00> : vector<1xf32>
    %60 = vector.multi_reduction <add>, %59, %cst_21 [0] : vector<4x1xf32> to vector<1xf32>
    %61 = vector.shape_cast %60 : vector<1xf32> to vector<1x1xf32>
    %62 = arith.addf %61, %27 : vector<1x1xf32>
    %63 = tpu.iota {dimensions = array<i32: 2>} : vector<1x8x128xi32>
    %c0_i32 = arith.constant 0 : i32
    %64 = vector.broadcast %c0_i32 : i32 to vector<1x8x128xi32>
    %65 = arith.cmpi eq, %63, %64 : vector<1x8x128xi32>
    %cst_22 = arith.constant 0.000000e+00 : f32
    %66 = vector.shape_cast %12 : vector<1x1xf32> to vector<1x1x1xf32>
    %67 = vector.broadcast %66 : vector<1x1x1xf32> to vector<1x8x128xf32>
    %68 = vector.broadcast %cst_22 : f32 to vector<1x8x128xf32>
    %69 = arith.select %65, %67, %68 : vector<1x8x128xi1>, vector<1x8x128xf32>
    %c1_i32 = arith.constant 1 : i32
    %70 = vector.broadcast %c1_i32 : i32 to vector<1x8x128xi32>
    %71 = arith.cmpi eq, %63, %70 : vector<1x8x128xi32>
    %cst_23 = arith.constant 0.000000e+00 : f32
    %72 = vector.shape_cast %15 : vector<1x1xf32> to vector<1x1x1xf32>
    %73 = vector.broadcast %72 : vector<1x1x1xf32> to vector<1x8x128xf32>
    %74 = vector.broadcast %cst_23 : f32 to vector<1x8x128xf32>
    %75 = arith.select %71, %73, %74 : vector<1x8x128xi1>, vector<1x8x128xf32>
    %76 = arith.addf %69, %75 : vector<1x8x128xf32>
    %c2_i32 = arith.constant 2 : i32
    %77 = vector.broadcast %c2_i32 : i32 to vector<1x8x128xi32>
    %78 = arith.cmpi eq, %63, %77 : vector<1x8x128xi32>
    %cst_24 = arith.constant 0.000000e+00 : f32
    %79 = vector.shape_cast %62 : vector<1x1xf32> to vector<1x1x1xf32>
    %80 = vector.broadcast %79 : vector<1x1x1xf32> to vector<1x8x128xf32>
    %81 = vector.broadcast %cst_24 : f32 to vector<1x8x128xf32>
    %82 = arith.select %78, %80, %81 : vector<1x8x128xi1>, vector<1x8x128xf32>
    %83 = arith.addf %76, %82 : vector<1x8x128xf32>
    %c0_25 = arith.constant 0 : index
    %c0_26 = arith.constant 0 : index
    %c0_27 = arith.constant 0 : index
    %84 = vector.load %arg6[%c0_25, %c0_26, %c0_27] : memref<1x8x128xf32, #tpu.memory_space<vmem>>, vector<1x8x128xf32>
    tpu.vector_store %arg6[%c0_25, %c0_26, %c0_27], %83 {strides = array<i32>} : memref<1x8x128xf32, #tpu.memory_space<vmem>>, vector<1x8x128xf32>,
    return
  }
  func.func @transform_0(%arg0: i32, %arg1: memref<8xi32, #tpu.memory_space<smem>>) -> (i32, i32, i32) {
    %0 = arith.index_cast %arg0 : i32 to index
    %1 = memref.load %arg1[%0] : memref<8xi32, #tpu.memory_space<smem>>
    %c0_i32 = arith.constant 0 : i32
    %c0_i32_0 = arith.constant 0 : i32
    %c0_i32_1 = arith.constant 0 : i32
    return %1, %c0_i32, %c0_i32_0 : i32, i32, i32
  }
  func.func @transform_1(%arg0: i32, %arg1: memref<8xi32, #tpu.memory_space<smem>>) -> (i32, i32) {
    %c0_i32 = arith.constant 0 : i32
    %c0_i32_0 = arith.constant 0 : i32
    %c0_i32_1 = arith.constant 0 : i32
    return %c0_i32, %c0_i32_0 : i32, i32
  }
  func.func @transform_2(%arg0: i32, %arg1: memref<8xi32, #tpu.memory_space<smem>>) -> (i32, i32) {
    %c0_i32 = arith.constant 0 : i32
    %c0_i32_0 = arith.constant 0 : i32
    %c0_i32_1 = arith.constant 0 : i32
    return %c0_i32, %c0_i32_0 : i32, i32
  }
  func.func @transform_3(%arg0: i32, %arg1: memref<8xi32, #tpu.memory_space<smem>>) -> (i32, i32) {
    %c0_i32 = arith.constant 0 : i32
    %c0_i32_0 = arith.constant 0 : i32
    %c0_i32_1 = arith.constant 0 : i32
    return %c0_i32, %c0_i32_0 : i32, i32
  }
  func.func @transform_4(%arg0: i32, %arg1: memref<8xi32, #tpu.memory_space<smem>>) -> (i32, i32, i32) {
    %c0_i32 = arith.constant 0 : i32
    %c0_i32_0 = arith.constant 0 : i32
    %c0_i32_1 = arith.constant 0 : i32
    return %arg0, %c0_i32, %c0_i32_0 : i32, i32, i32
  }
}

</mosaic_0001>

<bundles_post_ra>
// kernel: tpu_custom_call.1
= control target key start
LH: loop header
LB: loop body
LE: loop exit
PB: predicated region body
PF: predicated region fallthrough
CT: control target
= control target key end

     0   :  { %s741_s21 = smov [#allocation3]   ;;  %s965_s0 = inlined_call_operand.hbm [shape: s32[8], index: 0, kind: input, shape index: {}]   ;;  %s966_s1 = inlined_call_operand.hbm [shape: f32[16,8,128], index: 1, kind: input, shape index: {}]   ;;  %s967_s2 = inlined_call_operand.vmem [shape: f32[1,128], index: 2, kind: input, shape index: {}]   ;;  %s968_s3 = inlined_call_operand.vmem [shape: f32[1,128], index: 3, kind: input, shape index: {}]   ;;  %s969_s4 = inlined_call_operand.hbm [shape: f32[4,128], index: 4, kind: input, shape index: {}]   ;;  %s970_s5 = inlined_call_operand.hbm [shape: f32[8,8,128], index: 5, kind: output, shape index: {}]  }
   0x1   :  { %972 = sst [smem:[#allocation19_spill]] %s969_s4  ;;  %s11_s20 = sshll.u32 %s965_s0, 4  ;;  %s12_s20 = int_to_ptr.hbm [resolvable:$true] %s11_s20 }
   0x2   :  { %14 = dma.hbm_to_smem %s12_s20, 16, %s741_s21, [#allocation2] }
   0x3   :  { %699 = dma.done.wait [#allocation2], 16 }
   0x4   :  { %700 = vsyncadd [#allocation2], 4294967280 }
   0x5   :  { %17 = sfence }
   0x6   :  { %18 = vsyncpa [#allocation5], 0 }
   0x7   :  { %20 = vsyncpa [#allocation5 + $0x1], 0 }
   0x8   :  { %21 = vsyncpa [#allocation8], 0 }
   0x9   :  { %22 = vsyncpa [#allocation6], 0 }
   0xa   :  { %24 = vsyncpa [#allocation6 + $0x1], 0  ;;  %s780_s22 = smov 0   ;;  %s782_s23 = smov 0  }
   0xb   :  { %s784_s24 = smov 0   ;;  %s786_s25 = smov 0  }
   0xc   :  { %s788_s0 = smov 0   ;;  %s790_s26 = smov 0  }
   0xd   :  { %s792_s27 = smov 0  }
   0xe LB: > { %973 = sst [smem:[#allocation16_spill]] %s735_s26  ;;  %s814_s28 = sadd.s32 4294967295, %s739_s27   ;;  %s739_s27 = sphi %s792_s27, %s990_s27   ;;  %s735_s26 = sphi %s790_s26, %s984_s26   ;;  %s731_s0 = sphi %s788_s0, %s989_s0   ;;  %s727_s25 = sphi %s786_s25, %s988_s25   ;;  %s723_s24 = sphi %s784_s24, %s987_s24   ;;  %s719_s23 = sphi %s782_s23, %s986_s23   ;;  %s715_s22 = sphi %s780_s22, %s985_s22  }
   0xf   : > { %s457_s29 = sadd.s32 4294967294, %s739_s27   ;;  %s818_s30 = sadd.s32 1, %s739_s27  }
  0x10   : > { %p52_p0 = scmp.ne.s32.totalorder %s731_s0, %s727_s25  ;;  %p53_p1 = scmp.eq.s32.totalorder %s814_s28, 0 }
  0x11   : > { %s125_s6 = ssub.s32 %s739_s27, %s818_s30  ;;  %s128_s7 = sadd.s32 1, %s723_s24 }
  0x12   : > { %p126_p2 = scmp.eq.s32.totalorder %s125_s6, 0  ;;  %p827_p3 = por %p53_p1, %p52_p0 }
  0x13   : > { %p138_p4 = scmp.ne.s32.totalorder %s723_s24, %s719_s23  ;;  %p139_p5 = scmp.eq.s32.totalorder %s814_s28, 7 }
  0x14   : > { %s834_s9 = scalar_select %p126_p2, %s723_s24, %s128_s7  }
  0x15   : > { %p144_p6 = scmp.ne.s32.totalorder %s719_s23, %s715_s22  ;;  %p145_p7 = scmp.eq.s32.totalorder %s457_s29, 7 }
  0x16   : > { %975 = sst [smem:[#allocation17_spill]] %s834_s9  ;;  %p458_p8 = scmp.ge.s32.totalorder %s739_s27, 1 }
  0x17   : > { %p840_p9 = por %p139_p5, %p138_p4  ;;  %p152_p10 = scmp.lt.s32.totalorder %s739_s27, 9 }
  0x18   : > { %p845_p11 = por %p145_p7, %p144_p6  ;;  %s979_s4 = sld [smem:[#allocation19_spill]] }
  0x19   : > { %p849_p12 = pnand %p458_p8, %p152_p10  ;;  %s742_s16 = smov [#allocation7]  }
  0x1a   : > { %s172_s17 = sshll.u32 %s742_s16, 4  ;;  %s34_s18 = sld [smem:[#allocation3 + %s739_s27]]  ;;  %s173_s17 = int_to_ptr.vmem [resolvable:$true] %s172_s17 }
  0x1b   : > { %p483_p13 = pneg %p849_p12  ;;  %s35_s19 = sld [smem:[#allocation3 + %s818_s30]] }
  0x1c   : > { %p46_p2 = scmp.ne.s32.totalorder %s735_s26, %s731_s0  ;;  %p47_p4 = scmp.eq.s32.totalorder %s739_s27, 0 }
  0x1d   : > { %p484_p0 = pnand %p483_p13, %p53_p1  ;;  %s183_s20 = sand.u32 1, %s735_s26  }
  0x1e   : > { %s170_s15 = sshll.u32 %s979_s4, 4  ;;  %s39_s21 = sadd.s32 1, %s735_s26  ;;  %s171_s15 = int_to_ptr.hbm [resolvable:$true] %s170_s15 }
  0x1f   : > { %486 = dma.hbm_to_vmem [thread:$0]  (!%p484_p0), %s171_s15, 64, %s173_s17, [#allocation8]  }
  0x20   : > { %p48_p5 = por %p47_p4, %p46_p2  ;;  %p498_p6 = scmp.lt.s32.totalorder %s739_s27, 8 }
  0x21   : > { %s36_s25 = ssub.s32 %s34_s18, %s35_s19  ;;  %s461_s29 = sshll.u32 %s183_s20, 3 }
  0x22   : > { %p37_p7 = scmp.eq.s32.totalorder %s36_s25, 0  ;;  %p872_p8 = pnand %p498_p6, %p48_p5 }
  0x23   : > { %s475_s6 = scalar_select %p48_p5, [#allocation3], [#allocation10] }
  0x24   : > { %s869_s7 = scalar_select %p37_p7, %s735_s26, %s39_s21  }
  0x25   : > { %s476_s13 = scalar_select %p48_p5, %s739_s27, 0 }
  0x26   : > { %980 = sst [smem:[#allocation18_spill]] %s869_s7  ;;  %s992_s6 = smov (!%p498_p6, %s475_s6), [#allocation11] }
  0x27   : > { %s994_s13 = smov (!%p498_p6, %s476_s13), 0  ;;  %s187_s16 = scalar_lea.vmem [#allocation4], %s461_s29 }
  0x28   : > { %s188_s15 = sld [smem:[%s992_s6 + %s994_s13]]  ;;  %s196_s17 = sshll.u32 %s187_s16, 4  ;;  %s197_s17 = int_to_ptr.vmem [resolvable:$true] %s196_s17 }
  0x29   : > { %s184_s21 = scalar_lea.sflag [#allocation5], %s183_s20  ;;  %p617_p13 = pneg %p872_p8 }
  0x2a   : > { %s620_s13 = scalar_lea.hbm %s966_s1, 128 }
  0x2e   : > { %s462_s4 = sshll.u32 %s188_s15, 3 }
  0x2f   : > { %s192_s19 = scalar_lea.hbm %s966_s1, %s462_s4 }
  0x30   : > { %s194_s25 = sshll.u32 %s192_s19, 4  ;;  %s195_s25 = int_to_ptr.hbm [resolvable:$true] %s194_s25 }
  0x31   : > { %s613_s7 = sshra.s32 %s195_s25, 4  ;;  %s614_s7 = int_to_ptr.hbm [resolvable:$true] %s613_s7 }
  0x32   : > { %s615_s26 = scalar_lea.hbm %s614_s7, 8  ;;  %p621_p4 = scmp.lt.s32.totalorder %s614_s7, %s966_s1 }
  0x33   : > { %p616_p10 = scmp.ne.s32.totalorder %s614_s7, %s615_s26  ;;  %p622_p5 = scmp.lt.s32.totalorder %s620_s13, %s615_s26 }
  0x35   : > { %p618_p0 = pnand %p617_p13, %p616_p10  ;;  %p623_p6 = por %p622_p5, %p621_p4 }
  0x37   : > { %p619_p2 = pneg %p618_p0 }
  0x39   : > { %p624_p7 = pnand %p623_p6, %p619_p2 }
  0x3b   : > { %627 = shalt.err (!%p624_p7)
}
  0x3c   : > { %492 = dma.hbm_to_vmem [thread:$0]  (!%p872_p8), %s195_s25, 128, %s197_s17, %s184_s21  }
  0x3d   : > { %205 = sbr.rel (%p849_p12) target bundleno = 769 (0x301), region = 36  ;;  %s207_s4 = sand.u32 (!%p849_p12), 1, %s731_s0  }
  0x3e   : > { %s464_s9 = sshll.u32 (!%p849_p12), %s207_s4, 3  ;;  %s208_s20 = scalar_lea.sflag (!%p849_p12), [#allocation5], %s207_s4 }
  0x3f   : > { %s211_s18 = scalar_lea.vmem (!%p849_p12), [#allocation4], %s464_s9 }
  0x42   : > { %702 = dma.done.wait (%p827_p3), %s208_s20, 128  }
  0x43   : > { %704 = vsyncadd (%p827_p3), %s208_s20, 4294967168 }
  0x44   : > { %706 = dma.done.wait (%p53_p1), [#allocation8], 64  }
  0x45   : > { %708 = vsyncadd (%p53_p1), [#allocation8], 4294967232  ;;  %s243_s26 = sld [smem:[#allocation3 + %s814_s28]]  ;;  %v901_v0 = vld [vmem:[%s211_s18] sm:$0xff]  ;;  %v266_v1 = vlaneseq  ;;  %v246_v4 = vld [vmem:[%s968_s3] sm:$0x1] }
  0x46   : > { %261 = vst [vmem:[#allocation1] sm:$0xff] %v901_v0  ;;  %vm248_vm1 = vcmask 1040384   ;;  %v274_v9 = vld [vmem:[#allocation7] sm:$0xf]  ;;  %v743_v10 = vmov 0   ;;  %v744_v11 = vmov 1  }
  0x47   : > { %v904_v2 = vand.u32 127, %v266_v1  ;;  %563 = vset.pattern.permute.xlu0 %v743_v10  ;;  %564 = vset.pattern.permute.xlu1 %v744_v11  ;;  %vm296_vm2 = vcmp.gt.f32.partialorder %v901_v0, 0.5  ;;  %vm301_vm5 = vcmask 1043456   ;;  %v275_v33 = vld [vmem:[#allocation7] sm:$0x1]  ;;  %s745_s8 = smov 127  }
  0x48   : > { %v297_v17 = vsel %vm296_vm2, 1, %v743_v10  ;;  %v245_v35 = vld [vmem:[%s967_s2] sm:$0x1]  ;;  %vm331_vm10 = vcmask 19472   ;;  %s746_s19 = smov 126   ;;  %vm256_vm11 = vcmask 1041409  }
  0x49   : > { %v298_v19 = vperm.slane %v297_v17, 3  ;;  %v247_v36 = vmul.f32 %v245_v35, %v901_v0  ;;  %v566_v60 = vld [vmem:[%s967_s2] ss:$0 sm:$0xff]  ;;  %s239_s6 = sand.u32 1, %s719_s23   ;;  %s468_s13 = sshll.u32 %s814_s28, 3  ;;  %vm344_vm12 = vcmp.eq.s32.totalorder %v904_v2, 0 }
  0x4a   : > { %v255_v61 = vmul.f32 %v566_v60, %v901_v0  ;;  %s466_s29 = sshll.u32 %s239_s6, 3  ;;  %vm347_vm13 = vcmp.eq.s32.totalorder %v904_v2, 1  ;;  %s372_s9 = scalar_lea.hbm %s970_s5, %s468_s13  ;;  %vm351_vm14 = vcmp.eq.s32.totalorder %v904_v2, 2 }
  0x4b   : > { %v268_v3 = vstv %s243_s26  ;;  %vm299_vm3 = vcmp.eq.s32.totalorder %v298_v19, 1  ;;  %v249_v37 = vsel %vm248_vm1, %v247_v36, 0.0  ;;  %s241_s20 = scalar_lea.vmem [#allocation9], %s466_s29  ;;  %s376_s28 = sshll.u32 %s372_s9, 4  ;;  %s377_s28 = int_to_ptr.hbm [resolvable:$true] %s376_s28 }
  0x4c   : > { %vm269_vm0 = vcmp.eq.s32.totalorder %v904_v2, %v268_v3  ;;  %v257_v62 = vsel %vm256_vm11, %v255_v61, 0.0  ;;  %s374_s18 = sshll.u32 %s241_s20, 4  ;;  %s362_s26 = scalar_lea.sflag [#allocation6], %s239_s6  ;;  %s375_s18 = int_to_ptr.vmem [resolvable:$true] %s374_s18 }
  0x4d   : > { %v263_v5 = vld [vmem:[#allocation1 + $0x2] ss:$9 sm:$0xff]  ;;  %s657_s12 = sshra.s32 %s377_s28, 4  ;;  %s663_s17 = scalar_lea.hbm %s970_s5, 64  ;;  %s658_s12 = int_to_ptr.hbm [resolvable:$true] %s657_s12 }
  0x4e   : > { %v265_v6 = vsub.f32 %v246_v4, %v263_v5  ;;  %s659_s7 = scalar_lea.hbm %s658_s12, 8  ;;  %p664_p8 = scmp.lt.s32.totalorder %s658_s12, %s970_s5 }
  0x4f   : > { %p660_p1 = scmp.ne.s32.totalorder %s658_s12, %s659_s7  ;;  %p665_p10 = scmp.lt.s32.totalorder %s663_s17, %s659_s7 }
  0x50   : > { %v270_v7 = vsel %vm269_vm0, %v265_v6, 0.0  ;;  %v282_v15 = vperm.slane %v265_v6, 0 }
  0x51   : > { %v271_v8 = vsel %vm248_vm1, %v270_v7, 0.0  ;;  %p661_p3 = pnand %p660_p1, %p840_p9  ;;  %p666_p13 = por %p665_p10, %p664_p8 }
  0x52   : > { %272 = vadd.xlane.f32.xlu0 %v271_v8 }
  0x53   : > { %p662_p12 = pneg %p661_p3 }
  0x55   : > { %p667_p0 = pnand %p666_p13, %p662_p12 }
  0x66   : > { %278 = vperm.xlu0 %563, %v274_v9  }
  0x6e   : > { %565 = vset.pattern.permute.xlu0 %v744_v11 }
  0x90   : > { %250 = vadd.xlane.f32.xlu0 %v249_v37 }
  0xc5   : > { %v273_v12 = vpop.xlane.xlu0 %272 }
  0xc6   : > { %v285_v13 = vperm.slane %v273_v12, 0 }
  0xc8   : > { %v286_v14 = vmul.f32 %v285_v13, %v274_v9 }
  0xca   : > { %289 = vperm.xlu1 %564, %v286_v14  }
  0xd8   : > { %v279_v16 = vpop.permute.xlu0 %278 }
  0xd9   : > { %v284_v18 = vmul.f32 %v282_v15, %v279_v16 }
 0x103   : > { %v251_v1 = vpop.xlane.xlu0 %250 }
 0x104   : > { %v345_v3 = vperm.slane %v251_v1, 0 }
 0x106   : > { %v346_v5 = vsel %vm344_vm12, %v345_v3, 0.0 }
 0x13c   : > { %v290_v20 = vpop.permute.xlu1 %289 }
 0x13d   : > { %v292_v21 = vadd.f32 %v290_v20, %v284_v18 }
 0x13f   : > { %v294_v22 = vmul.f32 0.2, %v292_v21  ;;  %vm293_vm4 = vcmp.ge.f32.partialorder %v292_v21, 0.0 }
 0x141   : > { %v295_v23 = vsel %vm293_vm4, %v292_v21, %v294_v22 }
 0x142   : > { %v300_v24 = vsel %vm299_vm3, %v295_v23, -1e+30 }
 0x143   : > { %v302_v25 = vsel %vm301_vm5, %v300_v24, -inf }
 0x144   : > { %303 = vmax.xlane.f32.xlu1 %v302_v25 }
 0x1b7   : > { %v304_v26 = vpop.xlane.xlu1 %303 }
 0x1b8   : > { %v305_v27 = vsub.f32 %v300_v24, %v304_v26 }
 0x1ba   : > { %v306_v28 = vmul.f32 1.442695, %v305_v27 }
 0x1bc   : > { %567 = vpow2.f32 %v306_v28 }
 0x1c2   : > { %v568_v29 = vpop.eup %567 }
 0x1c3   : > { %v308_v30 = vsel %vm301_vm5, %v568_v29, 0.0  ;;  %v311_v31 = vmul.f32 %v568_v29, %v282_v15 }
 0x1c4   : > { %309 = vadd.xlane.f32.xlu2 %v308_v30 }
 0x1c5   : > { %v312_v32 = vsel %vm301_vm5, %v311_v31, 0.0 }
 0x1cc   : > { %313 = vadd.xlane.f32.xlu2 %v312_v32 }
 0x1e4   : > { %340 = vrot.lane.b32.xlu2 %v275_v33, %s745_s8 }
 0x237   : > { %v310_v34 = vpop.xlane.xlu2 %309 }
 0x238   : > { %569 = vrcp.f32 %v310_v34  ;;  %v326_v41 = vand.u32 2147483648, %v310_v34  ;;  %v324_v43 = vand.u32 2147483647, %v310_v34  ;;  %vm320_vm7 = vweird.f32 %v310_v34 }
 0x23a   : > { %v327_v46 = vor.u32 1.1754944e-38, %v326_v41  ;;  %vm325_vm9 = vcmp.eq.f32.partialorder %v324_v43, 8.507059e+37 }
 0x23e   : > { %v570_v38 = vpop.eup %569 }
 0x23f   : > { %v316_v39 = vmul.f32 %v570_v38, %v310_v34  ;;  %vm321_vm6 = vweird.f32 %v570_v38  ;;  %v314_v44 = vpop.xlane.xlu2 %313 }
 0x240   : > { %vm322_vm8 = vmor %vm320_vm7, %vm321_vm6  ;;  %v329_v48 = vmul.f32 %v314_v44, %v274_v9 }
 0x241   : > { %v317_v40 = vsub.f32 1.0, %v316_v39 }
 0x243   : > { %v318_v42 = vmul.f32 %v570_v38, %v317_v40 }
 0x245   : > { %v319_v45 = vadd.f32 %v570_v38, %v318_v42 }
 0x247   : > { %v323_v47 = vsel %vm322_vm8, %v570_v38, %v319_v45  ;;  %v341_v57 = vpop.permute.xlu2 %340 }
 0x248   : > { %v328_v49 = vsel %vm325_vm9, %v327_v46, %v323_v47 }
 0x249   : > { %v330_v50 = vmul.f32 %v329_v48, %v328_v49 }
 0x24b   : > { %v332_v51 = vsel %vm331_vm10, %v330_v50, 0.0 }
 0x24c   : > { %v333_v52 = vrot.slane %v332_v51, 4 }
 0x24e   : > { %v334_v53 = vadd.f32 %v333_v52, %v332_v51 }
 0x250   : > { %v335_v54 = vrot.slane %v334_v53, 2 }
 0x252   : > { %v336_v55 = vadd.f32 %v335_v54, %v334_v53 }
 0x254   : > { %v337_v56 = vrot.slane %v336_v55, 1 }
 0x256   : > { %v338_v58 = vadd.f32 %v337_v56, %v336_v55 }
 0x258   : > { %v343_v59 = vadd.f32 %v341_v57, %v338_v58 }
 0x25a   : > { %353 = vrot.lane.b32.xlu2 %v343_v59, %s746_s19 }
 0x283   : > { %258 = vadd.xlane.f32.xlu2 %v257_v62 }
 0x2b4   : > { %v354_v63 = vpop.permute.xlu2 %353 }
 0x2b5   : > { %471 = vpush %v354_v63 }
 0x2e6   : > { %s472_s15 = spop %471 }
 0x2e7   : > { %v356_v6 = vstv %s472_s15 }
 0x2e8   : > { %v358_v9 = vsel %vm351_vm14, %v356_v6, 0.0 }
 0x2f6   : > { %v259_v4 = vpop.xlane.xlu2 %258 }
 0x2f7   : > { %v348_v0 = vperm.slane %v259_v4, 1 }
 0x2f9   : > { %v349_v7 = vsel %vm347_vm13, %v348_v0, 0.0 }
 0x2fa   : > { %v350_v8 = vadd.f32 %v349_v7, %v346_v5 }
 0x2fc   : > { %v359_v10 = vadd.f32 %v358_v9, %v350_v8 }
 0x2fe   : > { %360 = vst [vmem:[%s241_s20] sm:$0xff] %v359_v10 }
 0x2ff   : > { %670 = shalt.err (!%p667_p0)
}
 0x300   : > { %481 = dma.vmem_to_hbm [thread:$0]  (%p840_p9), %s375_s18, 128, %s377_s28, %s362_s26  }
 0x301 PF: > { %p500_p2 = scmp.ge.s32.totalorder %s739_s27, 2  ;;  %s388_s21 = sand.u32 1, %s715_s22  }
 0x302   : > { %s389_s6 = scalar_lea.sflag [#allocation6], %s388_s21 }
 0x303   : > { %p494_p4 = pnand %p500_p2, %p845_p11 }
 0x305   : > { %p495_p5 = pneg %p494_p4 }
 0x307   : > { %710 = dma.done.wait (%p495_p5), %s389_s6, 128  }
 0x308   : > { %712 = vsyncadd (%p495_p5), %s389_s6, 4294967168  ;;  %s982_s29 = sld [smem:[#allocation17_spill]]  ;;  %p27_p9 = scmp.ge.s32.totalorder %s818_s30, 10  }
 0x309   : > { %s983_s13 = sld [smem:[#allocation16_spill]]  ;;  %s985_s22 = smov %s719_s23 }
 0x30a   : > { %s984_s26 = sld [smem:[#allocation18_spill]]  ;;  %s986_s23 = smov %s723_s24 }
 0x30b   : > { %s988_s25 = smov %s731_s0  ;;  %s990_s27 = smov %s818_s30 }
 0x30c   :  { %29 = sbr.rel (!%p27_p9) target bundleno = 14 (0xe), region = 86 }
 0x30e   : > { %s987_s24 = smov %s982_s29 }
 0x30f   : > { %s989_s0 = smov %s983_s13 }
 0x311   :  { %395 = vsyncpa [#allocation5], 1 }
 0x312   :  { %397 = vsyncpa [#allocation5 + $0x1], 1 }
 0x313   :  { %398 = vsyncpa [#allocation8], 1 }
 0x314   :  { %399 = vsyncpa [#allocation6], 1 }
 0x315   :  { %401 = vsyncpa [#allocation6 + $0x1], 1 }

</bundles_post_ra>
